<compile_context>
chip_gen: v7x
topology: tpu7x:2x2x1
jax: 0.10.0
libtpu: 0.0.40
codegen_flags: <defaults>
</compile_context>

<pallas_src>
import jax
import jax.numpy as jnp
from jax.experimental import pallas as pl
from jax.experimental.pallas import tpu as pltpu


def _round_up(n, m):
    return ((n + m - 1) // m) * m


def _generator_kernel(x_ref, wt_ref, b_ref, o_ref):
    """One (batch-tile, out-feature-tile): o = softsign(x @ Wt + b).

    x_ref : (TB, D)   activation tile
    wt_ref: (D, TN)   pre-transposed weight tile (in_features, out_features)
    b_ref : (1, TN)   bias row (f32)
    o_ref : (TB, TN)  output tile
    """
    # Canonical (M,K)x(K,N) contraction -> MXU, f32 accumulation.
    z = jnp.dot(x_ref[...], wt_ref[...], preferred_element_type=jnp.float32)
    z = z + b_ref[...]
    # softsign: z / (1 + |z|).  Reciprocal goes to the EUP slot (approx), so
    # only abs/add/mul land on the VALU.
    y = z * pl.reciprocal(1.0 + jnp.abs(z), approx=True)
    o_ref[...] = y.astype(o_ref.dtype)


def generator_network_forward(x, weight, bias, *, block_b=512, block_n=512,
                              compute_dtype=None):
    """softsign(x @ weight.T + bias), PyTorch nn.Linear semantics.

    x: (B, D) float; weight: (D, D) as (out_features, in_features); bias: (D,).
    Returns (B, D) in x.dtype.
    """
    B, D = x.shape
    assert weight.shape == (D, D) and bias.shape == (D,)
    out_dtype = x.dtype

    # bf16 matmul operands when the problem is MXU-bound (accumulation stays
    # f32 via preferred_element_type; bias/epilogue stay f32).
    if compute_dtype is None and D >= 1024 and x.dtype == jnp.float32:
        compute_dtype = jnp.bfloat16
    if compute_dtype is not None:
        x = x.astype(compute_dtype)
        weight = weight.astype(compute_dtype)

    # One-time wrapper transpose: (out,in) -> (in,out). Guarantees the kernel
    # never needs an in-kernel weight relayout.
    wt = weight.T
    b2 = bias.astype(jnp.float32).reshape(1, D)

    itemsize = jnp.dtype(x.dtype).itemsize
    sub = 8 if itemsize >= 4 else (16 if itemsize == 2 else 32)

    # Batch tiling: if B fits in one tile, use the full dim (no padding, no
    # ragged block, legal regardless of divisibility by 8). Otherwise use
    # sublane-aligned tiles; the last (ragged) block is masked by Pallas.
    if B <= block_b:
        TB = B
    else:
        TB = _round_up(block_b, sub)
    nb = pl.cdiv(B, TB)

    # Out-feature tiling: keep the weight fully VMEM-resident for small D;
    # tile N lane-densely for large D so the per-step weight block stays small
    # (v7x has only 64 MiB VMEM).
    if D >= 2048 and D % 128 == 0:
        TN = max(128, (min(block_n, D) // 128) * 128)
        while D % TN != 0:
            TN -= 128
    else:
        TN = D
    nj = pl.cdiv(D, TN)

    # Single-buffer the weight/bias when their index maps are constant across
    # the grid (default pipelining would double their VMEM footprint).
    w_kwargs = {}
    b_kwargs = {}
    if nj == 1:
        w_kwargs["pipeline_mode"] = pl.Buffered(1)
        b_kwargs["pipeline_mode"] = pl.Buffered(1)

    in_specs = [
        pl.BlockSpec((TB, D), lambda i, j: (i, 0)),              # x: batch-tiled
        pl.BlockSpec((D, TN), lambda i, j: (0, j), **w_kwargs),  # Wt: resident / N-tiled
        pl.BlockSpec((1, TN), lambda i, j: (0, j), **b_kwargs),  # bias
    ]
    out_spec = pl.BlockSpec((TB, TN), lambda i, j: (i, j))

    # VMEM budget (weight/bias buffer count reflects Buffered(1) choice).
    w_bufs = 1 if nj == 1 else 2
    vmem_need = (
        w_bufs * D * TN * jnp.dtype(wt.dtype).itemsize
        + w_bufs * TN * 4
        + 2 * TB * D * itemsize
        + 2 * TB * TN * jnp.dtype(out_dtype).itemsize
    )
    compiler_kwargs = dict(dimension_semantics=("parallel", "parallel"))
    if vmem_need > (16 << 20):  # above the smallest (v5e) scoped-VMEM default
        try:
            vmem_cap = pltpu.get_tpu_info().vmem_capacity_bytes
        except Exception:
            vmem_cap = 64 << 20  # conservative: v7x per-TC physical VMEM
        compiler_kwargs["vmem_limit_bytes"] = int(
            min(vmem_need * 5 // 4 + (1 << 20), vmem_cap - (8 << 20))
        )

    out = pl.pallas_call(
        _generator_kernel,
        out_shape=jax.ShapeDtypeStruct((B, D), out_dtype),
        grid=(nb, nj),
        in_specs=in_specs,
        out_specs=out_spec,
        compiler_params=pltpu.CompilerParams(**compiler_kwargs),
    )(x, wt, b2)
    return out


def _softsign_ref(x, weight, bias):
    z = x @ weight.T + bias
    return z / (1.0 + jnp.abs(z))


if __name__ == "__main__":
    num_descs = 32
    B = 8

    key = jax.random.PRNGKey(0)
    k_x, k_w, k_b, k_x2 = jax.random.split(key, 4)

    # --- Test 1: module's deterministic init (eye weight, zero bias) ---
    x = jax.random.normal(k_x, (B, num_descs), dtype=jnp.float32)
    weight = jnp.eye(num_descs, dtype=jnp.float32)          # (out, in)
    bias = jnp.zeros((num_descs,), dtype=jnp.float32)

    out = jax.block_until_ready(generator_network_forward(x, weight, bias))
    ref = _softsign_ref(x, weight, bias)
    assert out.shape == (B, num_descs)
    assert jnp.allclose(out, ref, atol=2e-3, rtol=2e-3), "mismatch (identity W)"

    # --- Test 2: random non-symmetric weight + a batch that forces real
    #             tiling with a ragged (masked) final block (block_b=128,
    #             B=300 -> blocks of 128/128/44), catching layout/transpose
    #             bugs that the identity weight would hide.
    B2 = 300
    x2 = jax.random.normal(k_x2, (B2, num_descs), dtype=jnp.float32)
    w2 = jax.random.normal(k_w, (num_descs, num_descs), dtype=jnp.float32) * 0.1
    b2 = jax.random.normal(k_b, (num_descs,), dtype=jnp.float32) * 0.1

    out2 = jax.block_until_ready(
        generator_network_forward(x2, w2, b2, block_b=128))
    ref2 = _softsign_ref(x2, w2, b2)
    assert out2.shape == (B2, num_descs)
    assert jnp.allclose(out2, ref2, atol=2e-3, rtol=2e-3), "mismatch (random W)"

    print("KERNEL_OK")
</pallas_src>

<mosaic_0001>
module attributes {stable_mosaic.version = 11 : i64} {
  func.func @_generator_kernel(%arg0: i32, %arg1: i32, %arg2: memref<8x32xf32, #tpu.memory_space<vmem>>, %arg3: memref<32x32xf32, #tpu.memory_space<vmem>>, %arg4: memref<1x32xf32, #tpu.memory_space<vmem>>, %arg5: memref<8x32xf32, #tpu.memory_space<vmem>>) attributes {dimension_semantics = [#tpu.dimension_semantics<parallel>, #tpu.dimension_semantics<parallel>], iteration_bounds = array<i64: 1, 1>, scalar_prefetch = 0 : i64, scratch_operands = 0 : i64, tpu.core_type = #tpu.core_type<tc>, window_params = [{transform_indices = @transform_0, window_bounds = array<i64: 8, 32>}, {pipeline_mode = #tpu.pipeline_mode<synchronous>, transform_indices = @transform_1, window_bounds = array<i64: 32, 32>}, {pipeline_mode = #tpu.pipeline_mode<synchronous>, transform_indices = @transform_2, window_bounds = array<i64: 1, 32>}, {transform_indices = @transform_3, window_bounds = array<i64: 8, 32>}]} {
    %c0 = arith.constant 0 : index
    %c0_0 = arith.constant 0 : index
    %0 = vector.load %arg2[%c0, %c0_0] : memref<8x32xf32, #tpu.memory_space<vmem>>, vector<8x32xf32>
    %c0_1 = arith.constant 0 : index
    %c0_2 = arith.constant 0 : index
    %1 = vector.load %arg3[%c0_1, %c0_2] : memref<32x32xf32, #tpu.memory_space<vmem>>, vector<32x32xf32>
    %cst = arith.constant dense<0.000000e+00> : vector<8x32xf32>
    %2 = tpu.matmul %0, %1, %cst {dimension_numbers = #tpu.dot_dimension_numbers<[1], [0], [0], [1], [0, 0, 1, 1], [], []>} : vector<8x32xf32>, vector<32x32xf32>, vector<8x32xf32> -> vector<8x32xf32>
    %c0_3 = arith.constant 0 : index
    %c0_4 = arith.constant 0 : index
    %3 = vector.load %arg4[%c0_3, %c0_4] : memref<1x32xf32, #tpu.memory_space<vmem>>, vector<1x32xf32>
    %4 = vector.broadcast %3 : vector<1x32xf32> to vector<8x32xf32>
    %5 = arith.addf %2, %4 : vector<8x32xf32>
    %6 = math.absf %5 : vector<8x32xf32>
    %cst_5 = arith.constant 1.000000e+00 : f32
    %7 = vector.broadcast %cst_5 : f32 to vector<8x32xf32>
    %8 = arith.addf %7, %6 : vector<8x32xf32>
    %9 = tpu.reciprocal %8 {approx = true} : vector<8x32xf32> -> vector<8x32xf32>
    %10 = arith.mulf %5, %9 : vector<8x32xf32>
    %c0_6 = arith.constant 0 : index
    %c0_7 = arith.constant 0 : index
    %11 = vector.load %arg5[%c0_6, %c0_7] : memref<8x32xf32, #tpu.memory_space<vmem>>, vector<8x32xf32>
    tpu.vector_store %arg5[%c0_6, %c0_7], %10 {strides = array<i32>} : memref<8x32xf32, #tpu.memory_space<vmem>>, vector<8x32xf32>,
    return
  }
  func.func @transform_0(%arg0: i32, %arg1: i32) -> (i32, i32) {
    %c0_i32 = arith.constant 0 : i32
    %c0_i32_0 = arith.constant 0 : i32
    return %arg0, %c0_i32 : i32, i32
  }
  func.func @transform_1(%arg0: i32, %arg1: i32) -> (i32, i32) {
    %c0_i32 = arith.constant 0 : i32
    %c0_i32_0 = arith.constant 0 : i32
    return %c0_i32, %arg1 : i32, i32
  }
  func.func @transform_2(%arg0: i32, %arg1: i32) -> (i32, i32) {
    %c0_i32 = arith.constant 0 : i32
    %c0_i32_0 = arith.constant 0 : i32
    return %c0_i32, %arg1 : i32, i32
  }
  func.func @transform_3(%arg0: i32, %arg1: i32) -> (i32, i32) {
    %c0_i32 = arith.constant 0 : i32
    return %arg0, %arg1 : i32, i32
  }
}

</mosaic_0001>

<bundles_post_ra>
// kernel: tpu_custom_call.1
= control target key start
LH: loop header
LB: loop body
LE: loop exit
PB: predicated region body
PF: predicated region fallthrough
CT: control target
= control target key end

     0   :  { %8 = vsyncpa [#allocation3], 0  ;;  %s328_s0 = inlined_call_operand.hbm [shape: f32[8,32], index: 0, kind: input, shape index: {}]   ;;  %s329_s1 = inlined_call_operand.hbm [shape: f32[32,32], index: 1, kind: input, shape index: {}]   ;;  %s330_s2 = inlined_call_operand.vmem [shape: f32[1,32], index: 2, kind: input, shape index: {}]   ;;  %s331_s3 = inlined_call_operand.hbm [shape: f32[8,32], index: 3, kind: output, shape index: {}]  }
   0x1   :  { %9 = vsyncpa [#allocation6], 0 }
   0x2   :  { %10 = vsyncpa [#allocation4], 0  ;;  %s254_s12 = smov [#allocation2]   ;;  %s255_s14 = smov [#allocation5]  }
   0x3   :  { %s17_s13 = sshll.u32 %s254_s12, 4  ;;  %s26_s15 = sshll.u32 %s255_s14, 4  ;;  %s18_s13 = int_to_ptr.vmem [resolvable:$true] %s17_s13  ;;  %s282_s15 = int_to_ptr.vmem [resolvable:$true] %s26_s15 }
   0x4   :  { %s182_s18 = scalar_lea.hbm %s328_s0, 128 }
   0x5   :  { %p183_p0 = scmp.ne.s32.totalorder %s328_s0, %s182_s18  ;;  %p186_p1 = scmp.lt.u32.totalorder %s182_s18, %s328_s0 }
   0x7   :  { %p188_p2 = pnand %p186_p1, %p183_p0 }
   0x9   :  { %191 = shalt.err (!%p188_p2)
}
   0xa   :  { %s192_s23 = scalar_lea.vmem %s18_s13, 128  ;;  %p197_p4 = scmp.lt.s32.totalorder %s18_s13, %s18_s13 }
   0xb   :  { %p193_p3 = scmp.ne.s32.totalorder %s18_s13, %s192_s23  ;;  %p198_p5 = scmp.lt.s32.totalorder %s192_s23, %s192_s23 }
   0xd   :  { %p199_p6 = por %p198_p5, %p197_p4 }
   0xf   :  { %p200_p7 = pnand %p199_p6, %p193_p3 }
  0x11   :  { %203 = shalt.err (!%p200_p7)
}
  0x12   :  { %20 = dma.hbm_to_vmem [thread:$0]  %s328_s0, 128, %s18_s13, [#allocation3]  }
  0x13   :  { %s204_s28 = scalar_lea.hbm %s329_s1, 512 }
  0x14   :  { %p205_p8 = scmp.ne.s32.totalorder %s329_s1, %s204_s28  ;;  %p208_p9 = scmp.lt.u32.totalorder %s204_s28, %s329_s1 }
  0x16   :  { %p210_p10 = pnand %p208_p9, %p205_p8 }
  0x18   :  { %213 = shalt.err (!%p210_p10)
}
  0x19   :  { %s214_s6 = scalar_lea.vmem %s282_s15, 512  ;;  %p219_p12 = scmp.lt.s32.totalorder %s282_s15, %s282_s15 }
  0x1a   :  { %p215_p11 = scmp.ne.s32.totalorder %s282_s15, %s214_s6  ;;  %p220_p13 = scmp.lt.s32.totalorder %s214_s6, %s214_s6 }
  0x1c   :  { %p221_p0 = por %p220_p13, %p219_p12 }
  0x1e   :  { %p222_p1 = pnand %p221_p0, %p215_p11 }
  0x20   :  { %225 = shalt.err (!%p222_p1)
}
  0x21   :  { %s256_s0 = smov 128   ;;  %s257_s7 = smov 8  }
  0x22   :  { %32 = dma.hbm_to_vmem [thread:$0]  %s329_s1, 512, %s282_s15, [#allocation6], %s256_s0, %s256_s0, %s257_s7  }
  0x23   :  { %248 = dma.done.wait [#allocation3], 128  }
  0x24   :  { %249 = vsyncadd [#allocation3], 4294967168 }
  0x25   :  { %250 = dma.done.wait [#allocation6], 512  }
  0x26   :  { %251 = vsyncadd [#allocation6], 4294966784  ;;  %v258_v0 = vmov 0.0|0.0   ;;  %vm259_vm0 = vmmov 0   ;;  %v260_v1 = vmov 0.0   ;;  %v42_v2 = vld [vmem:[#allocation5] sm:$0xff] }
  0x27   :  { %166 = vmatprep.subr.bf16.mxu0 %v258_v0  ;;  %163 = vmatprep.mubr.msk.f32.mxu0 %vm259_vm0, %v260_v1  ;;  %v43_v3 = vld [vmem:[#allocation5 + $0x8] sm:$0xff]  ;;  %v44_v4 = vld [vmem:[#allocation5 + $0x10] sm:$0xff]  ;;  %v45_v6 = vld [vmem:[#allocation5 + $0x18] sm:$0xff]  ;;  %vm53_vm1 = vcmask 261120   ;;  %s261_s11 = smov [#allocation7]  }
  0x28   :  { %v167_v5 = vpack.c.bf16 %v43_v3, %v42_v2  ;;  %v170_v7 = vpack.c.bf16 %v45_v6, %v44_v4  ;;  %v41_v8 = vld [vmem:[#allocation2] sm:$0xff]  ;;  %s138_s12 = sshll.u32 %s261_s11, 4  ;;  %s139_s12 = int_to_ptr.vmem [resolvable:$true] %s138_s12 }
  0x29   :  { %v148_v9 = vld [vmem:[%s330_s2] ss:$0 sm:$0xff]  ;;  %s226_s13 = scalar_lea.vmem %s139_s12, 128  ;;  %p231_p3 = scmp.lt.s32.totalorder %s139_s12, %s139_s12 }
  0x2a   :  { %168 = vmatpush3.bf16.msra.mxu0 %v167_v5  ;;  %p227_p2 = scmp.ne.s32.totalorder %s139_s12, %s226_s13  ;;  %p232_p4 = scmp.lt.s32.totalorder %s226_s13, %s226_s13 }
  0x2b   :  { %169 = vmatprep.subr.bf16.mxu0 %v258_v0 }
  0x2c   :  { %p233_p5 = por %p232_p4, %p231_p3 }
  0x2e   :  { %171 = vmatpush3.bf16.msra.mxu0 %v170_v7  ;;  %p234_p6 = pnand %p233_p5, %p227_p2 }
  0x31   :  { %164 = vmatmul.mubr.msk.f32.vlgmr.msra.gmra.mrb[0].mxu0 %vm53_vm1, %v41_v8 }
 0x104   :  { %v123_v10 = vpop.f32.mrb[0].mxu0 }
 0x105   :  { %v124_v11 = vadd.f32 %v148_v9, %v123_v10  ;;  %v165_v12 = vpop.f32.mrb[1].mxu0 }
 0x107   :  { %v127_v13 = vand.u32 2147483647, %v124_v11 }
 0x109   :  { %v128_v14 = vadd.f32 1.0, %v127_v13 }
 0x10b   :  { %180 = vrcp.f32 %v128_v14 }
 0x115   :  { %v181_v15 = vpop.eup %180 }
 0x116   :  { %v130_v16 = vmul.f32 %v181_v15, %v124_v11 }
 0x118   :  { %131 = vst.msk [vmem:[#allocation7] sm:$0xff] %vm53_vm1, %v130_v16 }
 0x119   :  { %237 = shalt.err (!%p234_p6)
}
 0x11a   :  { %s238_s15 = scalar_lea.hbm %s331_s3, 128 }
 0x11b   :  { %p239_p7 = scmp.ne.s32.totalorder %s331_s3, %s238_s15  ;;  %p242_p8 = scmp.lt.u32.totalorder %s238_s15, %s331_s3 }
 0x11d   :  { %p244_p9 = pnand %p242_p8, %p239_p7 }
 0x11f   :  { %247 = shalt.err (!%p244_p9)
}
 0x120   :  { %141 = dma.vmem_to_hbm [thread:$0]  %s139_s12, 128, %s331_s3, [#allocation4]  }
 0x121   :  { %252 = dma.done.wait [#allocation4], 128  }
 0x122   :  { %253 = vsyncadd [#allocation4], 4294967168 }
 0x123   :  { %145 = vsyncpa [#allocation3], 1 }
 0x124   :  { %146 = vsyncpa [#allocation6], 1 }
 0x125   :  { %147 = vsyncpa [#allocation4], 1 }

</bundles_post_ra>
